<compile_context>
chip_gen: v7x
topology: tpu7x:2x2x1
jax: 0.10.0
libtpu: 0.0.40
codegen_flags: <defaults>
</compile_context>

<pallas_src>
import functools

import jax
import jax.numpy as jnp
from jax.experimental import pallas as pl
from jax.experimental.pallas import tpu as pltpu

HIDDEN = 64


def _round_up(x, m):
    return (x + m - 1) // m * m


# ----------------------------------------------------------------------------
# Kernel: fused actor+critic MLP, one batch tile per grid step.
#   L1: x @ concat([Wa1, Wc1])            -> [TB, 128]
#   L2: h @ block_diag(Wa2, Wc2)          -> [TB, 128]
#   L3: h @ [128, OUT_W] (actor cols 0..A-1, critic col A, rest zero)
# ----------------------------------------------------------------------------
def _fused_actor_critic_kernel(action_dim,
                               state_ref,
                               w1_ref, b1_ref, w2_ref, b2_ref, w3_ref, b3_ref,
                               out_ref):
    # HIGHEST precision only matters for f32 inputs (multi-pass MXU); for bf16
    # weights DEFAULT is already single-pass bf16.
    prec = (jax.lax.Precision.HIGHEST
            if w1_ref.dtype == jnp.float32 else jax.lax.Precision.DEFAULT)

    x = state_ref[...]                                            # [TB, S]
    h = jnp.tanh(jnp.dot(x, w1_ref[...],
                         preferred_element_type=jnp.float32,
                         precision=prec) + b1_ref[...])           # [TB, 128] f32
    h = jnp.tanh(jnp.dot(h.astype(w2_ref.dtype), w2_ref[...],
                         preferred_element_type=jnp.float32,
                         precision=prec) + b2_ref[...])           # [TB, 128] f32
    z = jnp.dot(h.astype(w3_ref.dtype), w3_ref[...],
                preferred_element_type=jnp.float32,
                precision=prec) + b3_ref[...]                     # [TB, OUT_W] f32

    # tanh only the actor-mean lanes; the value lane (index A) stays linear;
    # padding lanes are zero because padded weights/biases are zero.
    lane = jax.lax.broadcasted_iota(jnp.int32, z.shape, 1)
    out_ref[...] = jnp.where(lane < action_dim, jnp.tanh(z), z).astype(out_ref.dtype)


# ----------------------------------------------------------------------------
# Wrapper
# ----------------------------------------------------------------------------
def actor_critic_forward(state, fused, action_dim, *, max_tile=1024):
    """state: [B, state_dim] -> (action_mean [B, A] f32, state_value [B, 1] f32)."""
    B, S = state.shape
    out_w = fused["w3"].shape[1]                 # round_up(action_dim + 1, 8)
    assert action_dim + 1 <= out_w

    # Tile choice: balance tiles (minimal padding), multiple of 8, capped at
    # max_tile, and >=2 tiles whenever B > 8 so v7x megacore gets both cores.
    n_tiles = pl.cdiv(B, max_tile)
    n_tiles = max(n_tiles, min(2, pl.cdiv(B, 8)))
    TB = _round_up(pl.cdiv(B, n_tiles), 8)
    B_pad = n_tiles * TB

    x = state.astype(fused["w1"].dtype)
    if B_pad != B:
        x = jnp.pad(x, ((0, B_pad - B), (0, 0)))

    def _pinned(arr):
        # Full-array block, same block every grid step -> VMEM-resident.
        return pl.BlockSpec(arr.shape, lambda i: (0, 0))

    in_specs = [
        pl.BlockSpec((TB, S), lambda i: (i, 0)),        # state tile
        _pinned(fused["w1"]), _pinned(fused["b1"]),
        _pinned(fused["w2"]), _pinned(fused["b2"]),
        _pinned(fused["w3"]), _pinned(fused["b3"]),
    ]
    out_specs = pl.BlockSpec((TB, out_w), lambda i: (i, 0))
    out_shape = jax.ShapeDtypeStruct((B_pad, out_w), jnp.float32)

    out = pl.pallas_call(
        functools.partial(_fused_actor_critic_kernel, action_dim),
        grid=(n_tiles,),
        in_specs=in_specs,
        out_specs=out_specs,
        out_shape=out_shape,
        compiler_params=pltpu.CompilerParams(
            dimension_semantics=("parallel",)),
    )(x, fused["w1"], fused["b1"], fused["w2"], fused["b2"],
      fused["w3"], fused["b3"])

    # NOTE: padded rows carry bias-driven values; slice before any reduction.
    action_mean = out[:B, :action_dim]
    state_value = out[:B, action_dim:action_dim + 1]
    return action_mean, state_value


# ----------------------------------------------------------------------------
# Parameter construction
# ----------------------------------------------------------------------------
def init_linear(key, fan_in, fan_out):
    """PyTorch-style default init: U(-1/sqrt(fan_in), 1/sqrt(fan_in))."""
    kw, kb = jax.random.split(key)
    bound = 1.0 / jnp.sqrt(jnp.float32(fan_in))
    w = jax.random.uniform(kw, (fan_in, fan_out), jnp.float32, -bound, bound)
    b = jax.random.uniform(kb, (1, fan_out), jnp.float32, -bound, bound)
    return w, b


def init_params(key, state_dim, action_dim):
    keys = jax.random.split(key, 6)
    wa1, ba1 = init_linear(keys[0], state_dim, HIDDEN)
    wa2, ba2 = init_linear(keys[1], HIDDEN, HIDDEN)
    wa3, ba3 = init_linear(keys[2], HIDDEN, action_dim)
    wc1, bc1 = init_linear(keys[3], state_dim, HIDDEN)
    wc2, bc2 = init_linear(keys[4], HIDDEN, HIDDEN)
    wc3, bc3 = init_linear(keys[5], HIDDEN, 1)
    return dict(wa1=wa1, ba1=ba1, wa2=wa2, ba2=ba2, wa3=wa3, ba3=ba3,
                wc1=wc1, bc1=bc1, wc2=wc2, bc2=bc2, wc3=wc3, bc3=bc3)


def fuse_params(p, action_dim, compute_dtype=jnp.float32):
    """Build concatenated / block-diagonal weights once (not per call)."""
    assert action_dim >= 1
    H = HIDDEN
    out_w = _round_up(action_dim + 1, 8)
    # Layer 1: concat along output lanes -> [S, 2H]
    w1 = jnp.concatenate([p["wa1"], p["wc1"]], axis=1)
    b1 = jnp.concatenate([p["ba1"], p["bc1"]], axis=1)
    # Layer 2: block-diagonal [2H, 2H]
    w2 = jnp.zeros((2 * H, 2 * H), jnp.float32)
    w2 = w2.at[:H, :H].set(p["wa2"]).at[H:, H:].set(p["wc2"])
    b2 = jnp.concatenate([p["ba2"], p["bc2"]], axis=1)
    # Layer 3: [2H, out_w]; actor -> lanes 0..A-1, critic -> lane A, rest zero
    w3 = jnp.zeros((2 * H, out_w), jnp.float32)
    w3 = w3.at[:H, :action_dim].set(p["wa3"])
    w3 = w3.at[H:, action_dim:action_dim + 1].set(p["wc3"])
    b3 = jnp.zeros((1, out_w), jnp.float32)
    b3 = b3.at[:, :action_dim].set(p["ba3"])
    b3 = b3.at[:, action_dim:action_dim + 1].set(p["bc3"])
    # Weights in compute_dtype (bf16 halves input DMA / doubles MXU rate on
    # v6e/v7x); biases stay f32 — bias add + tanh are done in f32 in-kernel.
    cd = compute_dtype
    return dict(w1=w1.astype(cd), b1=b1, w2=w2.astype(cd), b2=b2,
                w3=w3.astype(cd), b3=b3)


# ----------------------------------------------------------------------------
# Distribution glue (plain JAX) + fused act / evaluate entry points
# ----------------------------------------------------------------------------
def mvn_diag_logprob_entropy(action, mean, var):
    """MultivariateNormal with diagonal covariance (matches torch semantics)."""
    d = mean.shape[-1]
    log_det = jnp.sum(jnp.log(var))
    diff = action - mean
    maha = jnp.sum(diff * diff / var, axis=-1)
    logprob = -0.5 * (maha + d * jnp.log(2.0 * jnp.pi) + log_det)
    entropy = 0.5 * (d * (1.0 + jnp.log(2.0 * jnp.pi)) + log_det)
    return logprob, jnp.broadcast_to(entropy, logprob.shape)


@functools.partial(jax.jit, static_argnames=("action_dim",))
def ppo_act(state, fused, action_var, noise, action_dim):
    """ActorCritic.act(): one dispatch for kernel + sample + log_prob + value."""
    mean, value = actor_critic_forward(state, fused, action_dim)
    action = mean + jnp.sqrt(action_var) * noise          # reparameterized sample
    logprob, _ = mvn_diag_logprob_entropy(action, mean, action_var)
    return action, logprob, value


@functools.partial(jax.jit, static_argnames=("action_dim",))
def ppo_evaluate(state, action, fused, action_var, action_dim):
    """ActorCritic.evaluate(): one dispatch for kernel + log_prob + entropy + value."""
    mean, value = actor_critic_forward(state, fused, action_dim)
    logprob, entropy = mvn_diag_logprob_entropy(action, mean, action_var)
    return logprob, value, entropy


# ----------------------------------------------------------------------------
# Pure-JAX reference of the original PyTorch MLPs
# ----------------------------------------------------------------------------
def jax_reference(state, p):
    hp = jax.lax.Precision.HIGHEST
    h = jnp.tanh(jnp.dot(state, p["wa1"], precision=hp) + p["ba1"])
    h = jnp.tanh(jnp.dot(h, p["wa2"], precision=hp) + p["ba2"])
    mean = jnp.tanh(jnp.dot(h, p["wa3"], precision=hp) + p["ba3"])
    c = jnp.tanh(jnp.dot(state, p["wc1"], precision=hp) + p["bc1"])
    c = jnp.tanh(jnp.dot(c, p["wc2"], precision=hp) + p["bc2"])
    v = jnp.dot(c, p["wc3"], precision=hp) + p["bc3"]
    return mean, v


if __name__ == "__main__":
    key = jax.random.PRNGKey(0)
    k_param, k_state, k_noise = jax.random.split(key, 3)

    state_dim, action_dim, batch = 32, 4, 8
    action_std_init = 0.6
    action_var = jnp.full((action_dim,), action_std_init * action_std_init,
                          dtype=jnp.float32)

    params = init_params(k_param, state_dim, action_dim)
    fused = fuse_params(params, action_dim)            # built once, reused per call
    state = jax.random.normal(k_state, (batch, state_dim), jnp.float32)

    # --- Pallas fused actor + critic forward (the hot path) ------------------
    action_mean, state_val = actor_critic_forward(state, fused, action_dim)
    action_mean = jax.block_until_ready(action_mean)
    state_val = jax.block_until_ready(state_val)

    ref_mean, ref_val = jax_reference(state, params)
    assert jnp.allclose(action_mean, ref_mean, atol=1e-4, rtol=1e-4)
    assert jnp.allclose(state_val, ref_val, atol=1e-4, rtol=1e-4)
    assert action_mean.shape == (batch, action_dim)
    assert state_val.shape == (batch, 1)

    # --- act(): single fused dispatch (kernel + MVN sample/log_prob + value) --
    noise = jax.random.normal(k_noise, (batch, action_dim), jnp.float32)
    action, logprob, value = ppo_act(state, fused, action_var, noise, action_dim)
    jax.block_until_ready((action, logprob, value))
    assert action.shape == (batch, action_dim)
    assert logprob.shape == (batch,)
    assert value.shape == (batch, 1)
    assert bool(jnp.all(jnp.isfinite(logprob)))

    # --- evaluate(): single fused dispatch -----------------------------------
    logprobs, values, entropy = ppo_evaluate(state, action, fused, action_var,
                                             action_dim)
    jax.block_until_ready((logprobs, values, entropy))
    assert jnp.allclose(values, ref_val, atol=1e-4, rtol=1e-4)
    assert entropy.shape == (batch,)

    # --- non-multiple-of-tile batch: exercises padding / 2-tile split --------
    state2 = jax.random.normal(jax.random.PRNGKey(7), (13, state_dim), jnp.float32)
    m2, v2 = actor_critic_forward(state2, fused, action_dim)
    rm2, rv2 = jax_reference(state2, params)
    assert jnp.allclose(jax.block_until_ready(m2), rm2, atol=1e-4, rtol=1e-4)
    assert jnp.allclose(jax.block_until_ready(v2), rv2, atol=1e-4, rtol=1e-4)

    # --- optional bf16 compute path (v6e/v7x MXU; tanh/bias stay f32) --------
    fused_bf16 = fuse_params(params, action_dim, compute_dtype=jnp.bfloat16)
    m3, v3 = actor_critic_forward(state, fused_bf16, action_dim)
    jax.block_until_ready((m3, v3))
    assert jnp.allclose(m3, ref_mean, atol=5e-2, rtol=5e-2)
    assert jnp.allclose(v3, ref_val, atol=5e-2, rtol=5e-2)

    print("KERNEL_OK")
</pallas_src>

<mosaic_0001>
module attributes {stable_mosaic.version = 11 : i64} {
  func.func @_fused_actor_critic_kernel(%arg0: i32, %arg1: memref<8x32xf32, #tpu.memory_space<vmem>>, %arg2: memref<32x128xf32, #tpu.memory_space<vmem>>, %arg3: memref<1x128xf32, #tpu.memory_space<vmem>>, %arg4: memref<128x128xf32, #tpu.memory_space<vmem>>, %arg5: memref<1x128xf32, #tpu.memory_space<vmem>>, %arg6: memref<128x8xf32, #tpu.memory_space<vmem>>, %arg7: memref<1x8xf32, #tpu.memory_space<vmem>>, %arg8: memref<8x8xf32, #tpu.memory_space<vmem>>) attributes {dimension_semantics = [#tpu.dimension_semantics<parallel>], iteration_bounds = array<i64: 1>, scalar_prefetch = 0 : i64, scratch_operands = 0 : i64, tpu.core_type = #tpu.core_type<tc>, window_params = [{transform_indices = @transform_0, window_bounds = array<i64: 8, 32>}, {pipeline_mode = #tpu.pipeline_mode<synchronous>, transform_indices = @transform_1, window_bounds = array<i64: 32, 128>}, {pipeline_mode = #tpu.pipeline_mode<synchronous>, transform_indices = @transform_2, window_bounds = array<i64: 1, 128>}, {pipeline_mode = #tpu.pipeline_mode<synchronous>, transform_indices = @transform_3, window_bounds = array<i64: 128, 128>}, {pipeline_mode = #tpu.pipeline_mode<synchronous>, transform_indices = @transform_4, window_bounds = array<i64: 1, 128>}, {pipeline_mode = #tpu.pipeline_mode<synchronous>, transform_indices = @transform_5, window_bounds = array<i64: 128, 8>}, {pipeline_mode = #tpu.pipeline_mode<synchronous>, transform_indices = @transform_6, window_bounds = array<i64: 1, 8>}, {transform_indices = @transform_7, window_bounds = array<i64: 8, 8>}]} {
    %c0 = arith.constant 0 : index
    %c0_0 = arith.constant 0 : index
    %0 = vector.load %arg1[%c0, %c0_0] : memref<8x32xf32, #tpu.memory_space<vmem>>, vector<8x32xf32>
    %c0_1 = arith.constant 0 : index
    %c0_2 = arith.constant 0 : index
    %1 = vector.load %arg2[%c0_1, %c0_2] : memref<32x128xf32, #tpu.memory_space<vmem>>, vector<32x128xf32>
    %cst = arith.constant dense<0.000000e+00> : vector<8x128xf32>
    %2 = tpu.matmul %0, %1, %cst {dimension_numbers = #tpu.dot_dimension_numbers<[1], [0], [0], [1], [0, 0, 1, 1], [], []>, precision = #tpu.contract_precision<fp32>} : vector<8x32xf32>, vector<32x128xf32>, vector<8x128xf32> -> vector<8x128xf32>
    %c0_3 = arith.constant 0 : index
    %c0_4 = arith.constant 0 : index
    %3 = vector.load %arg3[%c0_3, %c0_4] : memref<1x128xf32, #tpu.memory_space<vmem>>, vector<1x128xf32>
    %4 = vector.broadcast %3 : vector<1x128xf32> to vector<8x128xf32>
    %5 = arith.addf %2, %4 : vector<8x128xf32>
    %6 = math.tanh %5 : vector<8x128xf32>
    %c0_5 = arith.constant 0 : index
    %c0_6 = arith.constant 0 : index
    %7 = vector.load %arg4[%c0_5, %c0_6] : memref<128x128xf32, #tpu.memory_space<vmem>>, vector<128x128xf32>
    %cst_7 = arith.constant dense<0.000000e+00> : vector<8x128xf32>
    %8 = tpu.matmul %6, %7, %cst_7 {dimension_numbers = #tpu.dot_dimension_numbers<[1], [0], [0], [1], [0, 0, 1, 1], [], []>, precision = #tpu.contract_precision<fp32>} : vector<8x128xf32>, vector<128x128xf32>, vector<8x128xf32> -> vector<8x128xf32>
    %c0_8 = arith.constant 0 : index
    %c0_9 = arith.constant 0 : index
    %9 = vector.load %arg5[%c0_8, %c0_9] : memref<1x128xf32, #tpu.memory_space<vmem>>, vector<1x128xf32>
    %10 = vector.broadcast %9 : vector<1x128xf32> to vector<8x128xf32>
    %11 = arith.addf %8, %10 : vector<8x128xf32>
    %12 = math.tanh %11 : vector<8x128xf32>
    %c0_10 = arith.constant 0 : index
    %c0_11 = arith.constant 0 : index
    %13 = vector.load %arg6[%c0_10, %c0_11] : memref<128x8xf32, #tpu.memory_space<vmem>>, vector<128x8xf32>
    %cst_12 = arith.constant dense<0.000000e+00> : vector<8x8xf32>
    %14 = tpu.matmul %12, %13, %cst_12 {dimension_numbers = #tpu.dot_dimension_numbers<[1], [0], [0], [1], [0, 0, 1, 1], [], []>, precision = #tpu.contract_precision<fp32>} : vector<8x128xf32>, vector<128x8xf32>, vector<8x8xf32> -> vector<8x8xf32>
    %c0_13 = arith.constant 0 : index
    %c0_14 = arith.constant 0 : index
    %15 = vector.load %arg7[%c0_13, %c0_14] : memref<1x8xf32, #tpu.memory_space<vmem>>, vector<1x8xf32>
    %16 = vector.broadcast %15 : vector<1x8xf32> to vector<8x8xf32>
    %17 = arith.addf %14, %16 : vector<8x8xf32>
    %18 = tpu.iota {dimensions = array<i32: 1>} : vector<8x8xi32>
    %c4_i32 = arith.constant 4 : i32
    %19 = vector.broadcast %c4_i32 : i32 to vector<8x8xi32>
    %20 = arith.cmpi slt, %18, %19 : vector<8x8xi32>
    %21 = math.tanh %17 : vector<8x8xf32>
    %22 = arith.select %20, %21, %17 : vector<8x8xi1>, vector<8x8xf32>
    %c0_15 = arith.constant 0 : index
    %c0_16 = arith.constant 0 : index
    %23 = vector.load %arg8[%c0_15, %c0_16] : memref<8x8xf32, #tpu.memory_space<vmem>>, vector<8x8xf32>
    tpu.vector_store %arg8[%c0_15, %c0_16], %22 {strides = array<i32>} : memref<8x8xf32, #tpu.memory_space<vmem>>, vector<8x8xf32>,
    return
  }
  func.func @transform_0(%arg0: i32) -> (i32, i32) {
    %c0_i32 = arith.constant 0 : i32
    %c0_i32_0 = arith.constant 0 : i32
    return %arg0, %c0_i32 : i32, i32
  }
  func.func @transform_1(%arg0: i32) -> (i32, i32) {
    %c0_i32 = arith.constant 0 : i32
    %c0_i32_0 = arith.constant 0 : i32
    %c0_i32_1 = arith.constant 0 : i32
    return %c0_i32, %c0_i32_0 : i32, i32
  }
  func.func @transform_2(%arg0: i32) -> (i32, i32) {
    %c0_i32 = arith.constant 0 : i32
    %c0_i32_0 = arith.constant 0 : i32
    %c0_i32_1 = arith.constant 0 : i32
    return %c0_i32, %c0_i32_0 : i32, i32
  }
  func.func @transform_3(%arg0: i32) -> (i32, i32) {
    %c0_i32 = arith.constant 0 : i32
    %c0_i32_0 = arith.constant 0 : i32
    %c0_i32_1 = arith.constant 0 : i32
    return %c0_i32, %c0_i32_0 : i32, i32
  }
  func.func @transform_4(%arg0: i32) -> (i32, i32) {
    %c0_i32 = arith.constant 0 : i32
    %c0_i32_0 = arith.constant 0 : i32
    %c0_i32_1 = arith.constant 0 : i32
    return %c0_i32, %c0_i32_0 : i32, i32
  }
  func.func @transform_5(%arg0: i32) -> (i32, i32) {
    %c0_i32 = arith.constant 0 : i32
    %c0_i32_0 = arith.constant 0 : i32
    %c0_i32_1 = arith.constant 0 : i32
    return %c0_i32, %c0_i32_0 : i32, i32
  }
  func.func @transform_6(%arg0: i32) -> (i32, i32) {
    %c0_i32 = arith.constant 0 : i32
    %c0_i32_0 = arith.constant 0 : i32
    %c0_i32_1 = arith.constant 0 : i32
    return %c0_i32, %c0_i32_0 : i32, i32
  }
  func.func @transform_7(%arg0: i32) -> (i32, i32) {
    %c0_i32 = arith.constant 0 : i32
    %c0_i32_0 = arith.constant 0 : i32
    return %arg0, %c0_i32 : i32, i32
  }
}

</mosaic_0001>

<bundles_post_ra>
// kernel: tpu_custom_call.1
= control target key start
LH: loop header
LB: loop body
LE: loop exit
PB: predicated region body
PF: predicated region fallthrough
CT: control target
= control target key end

     0   :  { %12 = vsyncpa [#allocation3], 0  ;;  %s3833_s0 = inlined_call_operand.vmem [shape: f32[8,32], index: 0, kind: input, shape index: {}]   ;;  %s3834_s1 = inlined_call_operand.hbm [shape: f32[32,128], index: 1, kind: input, shape index: {}]   ;;  %s3835_s2 = inlined_call_operand.vmem [shape: f32[1,128], index: 2, kind: input, shape index: {}]   ;;  %s3836_s3 = inlined_call_operand.vmem [shape: f32[128,128], index: 3, kind: input, shape index: {}]   ;;  %s3837_s4 = inlined_call_operand.vmem [shape: f32[1,128], index: 4, kind: input, shape index: {}]   ;;  %s3838_s5 = inlined_call_operand.vmem [shape: f32[128,8], index: 5, kind: input, shape index: {}]   ;;  %s3839_s6 = inlined_call_operand.vmem [shape: f32[1,8], index: 6, kind: input, shape index: {}]   ;;  %s3840_s7 = inlined_call_operand.hbm [shape: f32[8,8], index: 7, kind: output, shape index: {}]  }
   0x1   :  { %13 = vsyncpa [#allocation4], 0  ;;  %s3034_s24 = smov [#allocation2]   ;;  %s2986_s28 = scalar_lea.hbm %s3834_s1, 512 }
   0x2   :  { %s21_s25 = sshll.u32 %s3034_s24, 4  ;;  %p2987_p0 = scmp.ne.s32.totalorder %s3834_s1, %s2986_s28  ;;  %s22_s25 = int_to_ptr.vmem [resolvable:$true] %s21_s25 }
   0x3   :  { %p2990_p1 = scmp.lt.u32.totalorder %s2986_s28, %s3834_s1 }
   0x5   :  { %p2992_p2 = pnand %p2990_p1, %p2987_p0 }
   0x7   :  { %2995 = shalt.err (!%p2992_p2)
}
   0x8   :  { %s2996_s10 = scalar_lea.vmem %s22_s25, 512  ;;  %p3001_p4 = scmp.lt.s32.totalorder %s22_s25, %s22_s25 }
   0x9   :  { %p2997_p3 = scmp.ne.s32.totalorder %s22_s25, %s2996_s10  ;;  %p3002_p5 = scmp.lt.s32.totalorder %s2996_s10, %s2996_s10 }
   0xb   :  { %p3003_p6 = por %p3002_p5, %p3001_p4 }
   0xd   :  { %p3004_p7 = pnand %p3003_p6, %p2997_p3 }
   0xf   :  { %3007 = shalt.err (!%p3004_p7)
}
  0x10   :  { %s3035_s11 = smov 128   ;;  %s3036_s12 = smov 8  }
  0x11   :  { %27 = dma.hbm_to_vmem [thread:$0]  %s3834_s1, 512, %s22_s25, [#allocation3], %s3035_s11, %s3035_s11, %s3036_s12  }
  0x12   :  { %3030 = dma.done.wait [#allocation3], 512  }
  0x13   :  { %3031 = vsyncadd [#allocation3], 4294966784  ;;  %v3037_v0 = vmov 0.0|0.0   ;;  %vm3038_vm0 = vmmov 0   ;;  %v3867_v1 = vmov 0.0   ;;  %vm53_vm1 = vcmask 261120  }
  0x14   :  { %2617 = vmatprep.subr.bf16.mxu0 %v3037_v0  ;;  %2139 = vmatprep.mubr.msk.f32.mxu0 %vm3038_vm0, %v3867_v1  ;;  %v42_v2 = vld [vmem:[#allocation2] sm:$0xff]  ;;  %v43_v3 = vld [vmem:[#allocation2 + $0x8] sm:$0xff]  ;;  %v44_v4 = vld [vmem:[#allocation2 + $0x10] sm:$0xff]  ;;  %s3040_s29 = smov [#allocation5]   ;;  %vm1877_vm3 = vcmask 64512  }
  0x15   :  { %2653 = vmatprep.subr.bf16.mxu1 %v3037_v0  ;;  %2229 = vmatprep.mubr.msk.f32.mxu1 %vm3038_vm0, %v3867_v1  ;;  %v58_v5 = vand.u32 4294901760, %v42_v2  ;;  %v61_v6 = vand.u32 4294901760, %v43_v3  ;;  %v45_v7 = vld [vmem:[#allocation2 + $0x18] sm:$0xff]  ;;  %v64_v8 = vand.u32 4294901760, %v44_v4  ;;  %v41_v9 = vld [vmem:[%s3833_s0] sm:$0xff]  ;;  %v544_v13 = vld [vmem:[%s3836_s3 + $0x8] sm:$0xff] }
  0x16   :  { %v543_v10 = vld [vmem:[%s3836_s3] sm:$0xff]  ;;  %v67_v11 = vand.u32 4294901760, %v45_v7  ;;  %v55_v12 = vsel %vm53_vm1, %v41_v9, 0  ;;  %v570_v21 = vand.u32 4294901760, %v544_v13  ;;  %v545_v32 = vld [vmem:[%s3836_s3 + $0x10] sm:$0xff]  ;;  %v546_v33 = vld [vmem:[%s3836_s3 + $0x18] sm:$0xff] }
  0x17   :  { %v567_v14 = vand.u32 4294901760, %v543_v10  ;;  %v3108_v15 = vpack.c.bf16 %v61_v6, %v58_v5  ;;  %v3110_v16 = vsub.f32 %v42_v2, %v58_v5  ;;  %v145_v17 = vsub.f32 %v43_v3, %v61_v6  ;;  %v547_v55 = vld [vmem:[%s3836_s3 + $0x20] sm:$0xff]  ;;  %v548_v56 = vld [vmem:[%s3836_s3 + $0x28] sm:$0xff]  ;;  %v549_v60 = vld [vmem:[%s3836_s3 + $0x30] sm:$0xff]  ;;  %s1885_s30 = sshll.u32 %s3040_s29, 4  ;;  %s1886_s30 = int_to_ptr.vmem [resolvable:$true] %s1885_s30 }
  0x18   :  { %v3112_v18 = vsub.f32 %v44_v4, %v64_v8  ;;  %v3114_v19 = vsub.f32 %v45_v7, %v67_v11  ;;  %v3116_v20 = vand.u32 4294901760, %v55_v12  ;;  %v3119_v22 = vpack.c.bf16 %v67_v11, %v64_v8  ;;  %v550_v61 = vld [vmem:[%s3836_s3 + $0x38] sm:$0xff]  ;;  %v551_v3 = vld [vmem:[%s3836_s3 + $0x40] sm:$0xff]  ;;  %v552_v4 = vld [vmem:[%s3836_s3 + $0x48] sm:$0xff]  ;;  %s3008_s8 = scalar_lea.vmem %s1886_s30, 128  ;;  %p3013_p9 = scmp.lt.s32.totalorder %s1886_s30, %s1886_s30 }
  0x19   :  { %2619 = vmatpush3.bf16.msra.mxu0 %v3108_v15  ;;  %v139_v23 = vand.u32 4294901760, %v3110_v16  ;;  %v146_v24 = vand.u32 4294901760, %v145_v17  ;;  %v3126_v28 = vpack.c.bf16 %v570_v21, %v567_v14  ;;  %v3138_v36 = vsub.f32 %v543_v10, %v567_v14  ;;  %v553_v8 = vld [vmem:[%s3836_s3 + $0x50] sm:$0xff]  ;;  %v554_v9 = vld [vmem:[%s3836_s3 + $0x58] sm:$0xff]  ;;  %v556_v14 = vld [vmem:[%s3836_s3 + $0x68] sm:$0xff]  ;;  %p3009_p8 = scmp.ne.s32.totalorder %s1886_s30, %s3008_s8  ;;  %p3014_p10 = scmp.lt.s32.totalorder %s3008_s8, %s3008_s8 }
  0x1a   :  { %v153_v25 = vand.u32 4294901760, %v3112_v18  ;;  %2620 = vmatprep.subr.bf16.mxu0 %v3037_v0  ;;  %v127_v26 = vsub.f32 %v55_v12, %v3116_v20  ;;  %v160_v27 = vand.u32 4294901760, %v3114_v19  ;;  %v3141_v39 = vsub.f32 %v544_v13, %v570_v21  ;;  %v555_v13 = vld [vmem:[%s3836_s3 + $0x60] sm:$0xff]  ;;  %v557_v21 = vld [vmem:[%s3836_s3 + $0x70] sm:$0xff] }
  0x1b   :  { %v140_v29 = vsub.f32 %v3110_v16, %v139_v23  ;;  %v147_v30 = vsub.f32 %v145_v17, %v146_v24  ;;  %2655 = vmatpush3.bf16.msra.mxu1 %v3126_v28  ;;  %v573_v41 = vand.u32 4294901760, %v545_v32  ;;  %v576_v42 = vand.u32 4294901760, %v546_v33  ;;  %p3015_p11 = por %p3014_p10, %p3013_p9 }
  0x1c   :  { %v154_v31 = vsub.f32 %v3112_v18, %v153_v25  ;;  %v128_v34 = vand.u32 4294901760, %v127_v26  ;;  %v161_v35 = vsub.f32 %v3114_v19, %v160_v27  ;;  %2656 = vmatprep.subr.bf16.mxu1 %v3037_v0  ;;  %v2630_v51 = vpack.c.bf16 %v145_v17, %v3110_v16 }
  0x1d   :  { %2622 = vmatpush3.bf16.msra.mxu0 %v3119_v22  ;;  %v141_v37 = vand.u32 4294901760, %v140_v29  ;;  %v148_v38 = vand.u32 4294901760, %v147_v30  ;;  %v3145_v47 = vpack.c.bf16 %v576_v42, %v573_v41  ;;  %v3147_v48 = vsub.f32 %v545_v32, %v573_v41  ;;  %p3016_p12 = pnand %p3015_p11, %p3009_p8 }
  0x1e   :  { %v129_v40 = vsub.f32 %v127_v26, %v128_v34  ;;  %2623 = vmatprep.subr.bf16.mxu0 %v3037_v0  ;;  %v155_v44 = vand.u32 4294901760, %v154_v31  ;;  %v162_v45 = vand.u32 4294901760, %v161_v35  ;;  %v3149_v49 = vsub.f32 %v546_v33, %v576_v42 }
  0x1f   :  { %v2624_v43 = vpack.c.bf16 %v148_v38, %v141_v37  ;;  %2658 = vmatpush3.bf16.msra.mxu1 %v3145_v47  ;;  %v2633_v52 = vpack.c.bf16 %v3114_v19, %v3112_v18  ;;  %v2642_v53 = vpack.c.bf16 %v146_v24, %v139_v23  ;;  %v2645_v54 = vpack.c.bf16 %v160_v27, %v153_v25 }
  0x20   :  { %v130_v46 = vand.u32 4294901760, %v129_v40  ;;  %v2627_v50 = vpack.c.bf16 %v162_v45, %v155_v44  ;;  %2659 = vmatprep.subr.bf16.mxu1 %v3037_v0  ;;  %v579_v57 = vand.u32 4294901760, %v547_v55  ;;  %v582_v58 = vand.u32 4294901760, %v548_v56 }
  0x21   :  { %v585_v62 = vand.u32 4294901760, %v549_v60  ;;  %v588_v63 = vand.u32 4294901760, %v550_v61  ;;  %v591_v5 = vand.u32 4294901760, %v551_v3  ;;  %v594_v6 = vand.u32 4294901760, %v552_v4 }
  0x22   :  { %2140 = vmatmul.mubr.f32.vlgmr.msra.gmra.mrb[0].mxu0 %v130_v46  ;;  %v3191_v59 = vpack.c.bf16 %v582_v58, %v579_v57  ;;  %v597_v10 = vand.u32 4294901760, %v553_v8  ;;  %v600_v11 = vand.u32 4294901760, %v554_v9  ;;  %v606_v16 = vand.u32 4294901760, %v556_v14 }
  0x23   :  { %2625 = vmatpush3.bf16.msra.mxu0 %v2624_v43  ;;  %2150 = vmatprep.mubr.msk.f32.mxu0 %vm3038_vm0, %v3867_v1  ;;  %v3201_v2 = vpack.c.bf16 %v588_v63, %v585_v62  ;;  %v3211_v7 = vpack.c.bf16 %v594_v6, %v591_v5  ;;  %v3231_v17 = vsub.f32 %v547_v55, %v579_v57  ;;  %v609_v31 = vand.u32 4294901760, %v557_v21 }
  0x24   :  { %2626 = vmatprep.subr.bf16.mxu0 %v3037_v0  ;;  %2661 = vmatpush3.bf16.msra.mxu1 %v3191_v59  ;;  %v3221_v12 = vpack.c.bf16 %v600_v11, %v597_v10  ;;  %v3233_v18 = vsub.f32 %v548_v56, %v582_v58  ;;  %v3235_v19 = vsub.f32 %v549_v60, %v585_v62  ;;  %v3865_v33 = vand.u32 4294901760, %v3138_v36 }
  0x25   :  { %2662 = vmatprep.subr.bf16.mxu1 %v3037_v0  ;;  %v3245_v23 = vsub.f32 %v551_v3, %v591_v5  ;;  %v3247_v24 = vsub.f32 %v552_v4, %v594_v6  ;;  %v3249_v25 = vsub.f32 %v553_v8, %v597_v10  ;;  %v3257_v30 = vsub.f32 %v556_v14, %v606_v16 }
  0x26   :  { %v3262_v35 = vsub.f32 %v557_v21, %v609_v31  ;;  %v661_v40 = vsub.f32 %v3138_v36, %v3865_v33  ;;  %v3859_v44 = vand.u32 4294901760, %v3147_v48  ;;  %v3855_v45 = vand.u32 4294901760, %v3149_v49 }
  0x27   :  { %2628 = vmatpush3.bf16.msra.mxu0 %v2627_v50  ;;  %v3853_v55 = vand.u32 4294901760, %v3233_v18  ;;  %v3852_v62 = vand.u32 4294901760, %v3235_v19  ;;  %v3847_v10 = vand.u32 4294901760, %v3247_v24  ;;  %v3846_v21 = vand.u32 4294901760, %v3249_v25 }
  0x28   :  { %2629 = vmatprep.subr.bf16.mxu0 %v3037_v0  ;;  %2664 = vmatpush3.bf16.msra.mxu1 %v3201_v2  ;;  %v662_v42 = vand.u32 4294901760, %v661_v40  ;;  %v675_v50 = vsub.f32 %v3147_v48, %v3859_v44 }
  0x29   :  { %2665 = vmatprep.subr.bf16.mxu1 %v3037_v0  ;;  %v696_v58 = vsub.f32 %v3233_v18, %v3853_v55  ;;  %v703_v4 = vsub.f32 %v3235_v19, %v3852_v62  ;;  %v724_v14 = vsub.f32 %v3247_v24, %v3847_v10 }
  0x2a   :  { %2151 = vmatmul.mubr.f32.vlgmr.msra.gmra.mrb[0].mxu0 %v3116_v20 }
  0x2b   :  { %2631 = vmatpush3.bf16.msra.mxu0 %v2630_v51  ;;  %2161 = vmatprep.mubr.msk.f32.mxu0 %vm3038_vm0, %v3867_v1  ;;  %v682_v51 = vsub.f32 %v3149_v49, %v3855_v45  ;;  %v704_v6 = vand.u32 4294901760, %v703_v4 }
  0x2c   :  { %2632 = vmatprep.subr.bf16.mxu0 %v3037_v0  ;;  %2667 = vmatpush3.bf16.msra.mxu1 %v3211_v7 }
  0x2d   :  { %2668 = vmatprep.subr.bf16.mxu1 %v3037_v0 }
  0x2f   :  { %2634 = vmatpush3.bf16.msra.mxu0 %v2633_v52  ;;  %v676_v52 = vand.u32 4294901760, %v675_v50  ;;  %v3843_v50 = vand.u32 4294901760, %v3257_v30 }
  0x30   :  { %2635 = vmatprep.subr.bf16.mxu0 %v3037_v0  ;;  %2670 = vmatpush3.bf16.msra.mxu1 %v3221_v12 }
  0x31   :  { %2671 = vmatprep.subr.bf16.mxu1 %v3037_v0 }
  0x32   :  { %2162 = vmatmul.mubr.f32.vlgmr.msra.gmra.mrb[0].mxu0 %v127_v26  ;;  %v3251_v26 = vsub.f32 %v554_v9, %v600_v11  ;;  %v3848_v9 = vand.u32 4294901760, %v3245_v23 }
  0x33   :  { %2637 = vmatpush3.bf16.msra.mxu0 %v3108_v15  ;;  %2172 = vmatprep.mubr.msk.f32.mxu0 %vm3038_vm0, %v3867_v1 }
  0x34   :  { %2638 = vmatprep.subr.bf16.mxu0 %v3037_v0 }
  0x37   :  { %2640 = vmatpush3.bf16.msra.mxu0 %v3119_v22 }
  0x38   :  { %2641 = vmatprep.subr.bf16.mxu0 %v3037_v0 }
  0x3a   :  { %2173 = vmatmul.mubr.f32.vlgmr.msra.gmra.mrb[0].mxu0 %v128_v34  ;;  %v3863_v34 = vand.u32 4294901760, %v3141_v39 }
  0x3b   :  { %2643 = vmatpush3.bf16.msra.mxu0 %v2642_v53  ;;  %2183 = vmatprep.mubr.msk.f32.mxu0 %vm3038_vm0, %v3867_v1  ;;  %v683_v53 = vand.u32 4294901760, %v682_v51 }
  0x3c   :  { %2644 = vmatprep.subr.bf16.mxu0 %v3037_v0  ;;  %v668_v41 = vsub.f32 %v3141_v39, %v3863_v34 }
  0x3d   :  { %v3289_v56 = vpack.c.bf16 %v683_v53, %v676_v52  ;;  %v752_v53 = vsub.f32 %v3257_v30, %v3843_v50 }
  0x3e   :  { %v669_v43 = vand.u32 4294901760, %v668_v41 }
  0x3f   :  { %2646 = vmatpush3.bf16.msra.mxu0 %v2645_v54  ;;  %v3854_v54 = vand.u32 4294901760, %v3231_v17 }
  0x40   :  { %2647 = vmatprep.subr.bf16.mxu0 %v3037_v0  ;;  %v3279_v46 = vpack.c.bf16 %v669_v43, %v662_v42 }
  0x41   :  { %v689_v57 = vsub.f32 %v3231_v17, %v3854_v54 }
  0x42   :  { %2184 = vmatmul.mubr.f32.vlgmr.msra.gmra.mrb[0].mxu0 %v3116_v20 }
  0x43   :  { %2649 = vmatpush3.bf16.msra.mxu0 %v3108_v15  ;;  %2194 = vmatprep.mubr.msk.f32.mxu0 %vm3038_vm0, %v3867_v1  ;;  %v603_v15 = vand.u32 4294901760, %v555_v13  ;;  %v690_v60 = vand.u32 4294901760, %v689_v57 }
  0x44   :  { %2650 = vmatprep.subr.bf16.mxu0 %v3037_v0 }
  0x45   :  { %v3253_v27 = vpack.c.bf16 %v606_v16, %v603_v15  ;;  %v3255_v29 = vsub.f32 %v555_v13, %v603_v15  ;;  %v717_v13 = vsub.f32 %v3245_v23, %v3848_v9  ;;  %v725_v16 = vand.u32 4294901760, %v724_v14 }
  0x47   :  { %2652 = vmatpush3.bf16.msra.mxu0 %v3119_v22  ;;  %v558_v22 = vld [vmem:[%s3836_s3 + $0x78] sm:$0xff]  ;;  %2673 = vmatpush3.bf16.msra.mxu1 %v3253_v27  ;;  %v718_v15 = vand.u32 4294901760, %v717_v13  ;;  %v3844_v43 = vand.u32 4294901760, %v3255_v29 }
  0x48   :  { %2821 = vmatprep.subr.bf16.mxu0 %v3037_v0  ;;  %v612_v32 = vand.u32 4294901760, %v558_v22  ;;  %2674 = vmatprep.subr.bf16.mxu1 %v3037_v0 }
  0x49   :  { %v745_v52 = vsub.f32 %v3255_v29, %v3844_v43 }
  0x4a   :  { %2195 = vmatmul.mubr.f32.vlgmr.msra.gmra.mrb[0].mxu0 %v3116_v20  ;;  %v3237_v20 = vsub.f32 %v550_v61, %v588_v63  ;;  %v3265_v37 = vpack.c.bf16 %v612_v32, %v609_v31  ;;  %v3267_v38 = vsub.f32 %v558_v22, %v612_v32  ;;  %v697_v61 = vand.u32 4294901760, %v696_v58 }
  0x4b   :  { %2474 = vmatprep.mubr.msk.f32.mxu0 %vm3038_vm0, %v3867_v1  ;;  %v3845_v22 = vand.u32 4294901760, %v3251_v26  ;;  %v2690_v31 = vpack.c.bf16 %v725_v16, %v718_v15  ;;  %v731_v32 = vsub.f32 %v3249_v25, %v3846_v21  ;;  %v746_v57 = vand.u32 4294901760, %v745_v52 }
  0x4c   :  { %2676 = vmatpush3.bf16.msra.mxu1 %v3265_v37  ;;  %v3849_v63 = vand.u32 4294901760, %v3237_v20  ;;  %v2684_v3 = vpack.c.bf16 %v697_v61, %v690_v60  ;;  %v753_v58 = vand.u32 4294901760, %v752_v53  ;;  %v3842_v60 = vand.u32 4294901760, %v3262_v35 }
  0x4d   :  { %2677 = vmatprep.subr.bf16.mxu1 %v3037_v0  ;;  %v738_v40 = vsub.f32 %v3251_v26, %v3845_v22  ;;  %v732_v41 = vand.u32 4294901760, %v731_v32  ;;  %v3841_v61 = vand.u32 4294901760, %v3267_v38  ;;  %v2702_v15 = vpack.c.bf16 %v3141_v39, %v3138_v36 }
  0x4e   :  { %v710_v5 = vsub.f32 %v3237_v20, %v3849_v63  ;;  %v2696_v4 = vpack.c.bf16 %v753_v58, %v746_v57  ;;  %v2705_v16 = vpack.c.bf16 %v3149_v49, %v3147_v48  ;;  %v2708_v32 = vpack.c.bf16 %v3233_v18, %v3231_v17  ;;  %v1894_v57 = vld [vmem:[%s3835_s2] ss:$0 sm:$0xff] }
  0x4f   :  { %v739_v42 = vand.u32 4294901760, %v738_v40  ;;  %v2711_v40 = vpack.c.bf16 %v3237_v20, %v3235_v19  ;;  %v2720_v52 = vpack.c.bf16 %v3257_v30, %v3255_v29 }
  0x50   :  { %v711_v8 = vand.u32 4294901760, %v710_v5  ;;  %v759_v5 = vsub.f32 %v3262_v35, %v3842_v60 }
  0x51   :  { %v2693_v51 = vpack.c.bf16 %v739_v42, %v732_v41  ;;  %v2714_v41 = vpack.c.bf16 %v3247_v24, %v3245_v23  ;;  %v2717_v42 = vpack.c.bf16 %v3251_v26, %v3249_v25 }
  0x52   :  { %v2687_v11 = vpack.c.bf16 %v711_v8, %v704_v6  ;;  %v766_v6 = vsub.f32 %v3267_v38, %v3841_v61  ;;  %v760_v8 = vand.u32 4294901760, %v759_v5 }
  0x54   :  { %v767_v13 = vand.u32 4294901760, %v766_v6 }
  0x56   :  { %v2699_v14 = vpack.c.bf16 %v767_v13, %v760_v8 }
 0x11d   :  { %v538_v58 = vpop.f32.mrb[0].mxu0 }
 0x11e   :  { %v2941_v5 = vadd.f32 %v1894_v57, %v538_v58  ;;  %v2196_v6 = vpop.f32.mrb[1].mxu0  ;;  %v3408_v58 = vld [vmem:[%s3838_s5 + $0x30] sm:$0xff] }
 0x120   :  { %2980 = vtanh.f32 %v2941_v5  ;;  %v3413_v5 = vld [vmem:[%s3838_s5 + $0x38] sm:$0xff] }
 0x12a   :  { %v2981_v8 = vpop.eup %2980 }
 0x12b   :  { %v3356_v13 = vand.u32 4294901760, %v2981_v8 }
 0x12d   :  { %v3359_v61 = vsub.f32 %v2981_v8, %v3356_v13 }
 0x12f   :  { %v3862_v60 = vand.u32 4294901760, %v3359_v61 }
 0x131   :  { %v650_v50 = vsub.f32 %v3359_v61, %v3862_v60 }
 0x133   :  { %v651_v43 = vand.u32 4294901760, %v650_v50 }
 0x135   :  { %2230 = vmatmul.mubr.f32.vlgmr.msra.gmra.mrb[0].mxu1 %v651_v43  ;;  %v1211_v43 = vld [vmem:[%s3838_s5 + $0x18] sm:$0xff] }
 0x136   :  { %2679 = vmatpush3.bf16.msra.mxu1 %v3279_v46  ;;  %2264 = vmatprep.mubr.msk.f32.mxu1 %vm3038_vm0, %v3867_v1  ;;  %v1208_v46 = vld [vmem:[%s3838_s5] sm:$0xff] }
 0x137   :  { %2680 = vmatprep.subr.bf16.mxu1 %v3037_v0 }
 0x13a   :  { %2682 = vmatpush3.bf16.msra.mxu1 %v3289_v56  ;;  %v1209_v56 = vld [vmem:[%s3838_s5 + $0x8] sm:$0xff] }
 0x13b   :  { %2683 = vmatprep.subr.bf16.mxu1 %v3037_v0 }
 0x13e   :  { %2685 = vmatpush3.bf16.msra.mxu1 %v2684_v3  ;;  %v1210_v3 = vld [vmem:[%s3838_s5 + $0x10] sm:$0xff] }
 0x13f   :  { %2686 = vmatprep.subr.bf16.mxu1 %v3037_v0  ;;  %v1238_v50 = vand.u32 4294901760, %v1210_v3 }
 0x141   :  { %v3419_v22 = vsub.f32 %v1210_v3, %v1238_v50 }
 0x142   :  { %2688 = vmatpush3.bf16.msra.mxu1 %v2687_v11  ;;  %v1232_v11 = vand.u32 4294901760, %v1208_v46 }
 0x143   :  { %2689 = vmatprep.subr.bf16.mxu1 %v3037_v0 }
 0x144   :  { %v3415_v6 = vsub.f32 %v1208_v46, %v1232_v11  ;;  %v3856_v46 = vand.u32 4294901760, %v3408_v58 }
 0x146   :  { %2691 = vmatpush3.bf16.msra.mxu1 %v2690_v31  ;;  %v1235_v31 = vand.u32 4294901760, %v1209_v56 }
 0x147   :  { %2692 = vmatprep.subr.bf16.mxu1 %v3037_v0 }
 0x148   :  { %v3417_v8 = vsub.f32 %v1209_v56, %v1235_v31  ;;  %v3421_v21 = vpack.c.bf16 %v1235_v31, %v1232_v11  ;;  %v3857_v56 = vand.u32 4294901760, %v3415_v6  ;;  %v3860_v11 = vand.u32 4294901760, %v3419_v22 }
 0x149   :  { %v3861_v31 = vand.u32 4294901760, %v3413_v5 }
 0x14a   :  { %2694 = vmatpush3.bf16.msra.mxu1 %v2693_v51  ;;  %v3395_v51 = vld [vmem:[%s3838_s5 + $0x20] sm:$0xff]  ;;  %v3858_v3 = vand.u32 4294901760, %v3417_v8  ;;  %v1326_v62 = vsub.f32 %v3415_v6, %v3857_v56  ;;  %v1340_v54 = vsub.f32 %v3419_v22, %v3860_v11 }
 0x14b   :  { %2695 = vmatprep.subr.bf16.mxu1 %v3037_v0  ;;  %v3461_v45 = vsub.f32 %v3413_v5, %v3861_v31 }
 0x14c   :  { %v1333_v55 = vsub.f32 %v3417_v8, %v3858_v3  ;;  %v1327_v11 = vand.u32 4294901760, %v1326_v62  ;;  %v1341_v60 = vand.u32 4294901760, %v1340_v54 }
 0x14d   :  { %v1374_v34 = vand.u32 4294901760, %v3461_v45 }
 0x14e   :  { %2697 = vmatpush3.bf16.msra.mxu1 %v2696_v4  ;;  %v3400_v4 = vld [vmem:[%s3838_s5 + $0x28] sm:$0xff]  ;;  %v1334_v31 = vand.u32 4294901760, %v1333_v55 }
 0x14f   :  { %2698 = vmatprep.subr.bf16.mxu1 %v3037_v0  ;;  %v3851_v57 = vand.u32 4294901760, %v3400_v4  ;;  %v1375_v55 = vsub.f32 %v3461_v45, %v1374_v34 }
 0x150   :  { %v2822_v33 = vpack.c.bf16 %v1334_v31, %v1327_v11 }
 0x151   :  { %v3433_v63 = vsub.f32 %v3400_v4, %v3851_v57 }
 0x152   :  { %2700 = vmatpush3.bf16.msra.mxu1 %v2699_v14  ;;  %v1241_v14 = vand.u32 4294901760, %v1211_v43  ;;  %2823 = vmatpush3.bf16.msra.mxu0 %v2822_v33 }
 0x153   :  { %2701 = vmatprep.subr.bf16.mxu1 %v3037_v0  ;;  %v3869_v57 = vand.u32 4294901760, %v3433_v63  ;;  %2824 = vmatprep.subr.bf16.mxu0 %v3037_v0 }
 0x154   :  { %v3423_v10 = vsub.f32 %v1211_v43, %v1241_v14 }
 0x155   :  { %2265 = vmatmul.mubr.f32.vlgmr.msra.gmra.mrb[0].mxu1 %v3356_v13  ;;  %v1361_v3 = vsub.f32 %v3433_v63, %v3869_v57 }
 0x156   :  { %2703 = vmatpush3.bf16.msra.mxu1 %v2702_v15  ;;  %2299 = vmatprep.mubr.msk.f32.mxu1 %vm3038_vm0, %v3867_v1  ;;  %v3850_v15 = vand.u32 4294901760, %v3395_v51  ;;  %v3864_v43 = vand.u32 4294901760, %v3423_v10 }
 0x157   :  { %2704 = vmatprep.subr.bf16.mxu1 %v3037_v0  ;;  %v1362_v53 = vand.u32 4294901760, %v1361_v3  ;;  %v3882_v3 = vand.u32 4294901760, %v3247_v24  ;;  %v3888_v24 = vand.u32 4294901760, %v3267_v38 }
 0x158   :  { %v3428_v9 = vsub.f32 %v3395_v51, %v3850_v15 }
 0x15a   :  { %2706 = vmatpush3.bf16.msra.mxu1 %v2705_v16  ;;  %v3866_v15 = vand.u32 4294901760, %v3428_v9  ;;  %v3447_v16 = vsub.f32 %v3408_v58, %v3856_v46  ;;  %v1347_v46 = vsub.f32 %v3423_v10, %v3864_v43 }
 0x15b   :  { %2707 = vmatprep.subr.bf16.mxu1 %v3037_v0 }
 0x15c   :  { %v1354_v56 = vsub.f32 %v3428_v9, %v3866_v15  ;;  %v1367_v44 = vand.u32 4294901760, %v3447_v16  ;;  %v1348_v43 = vand.u32 4294901760, %v1347_v46  ;;  %v3478_v15 = vpack.c.bf16 %v1241_v14, %v1238_v50 }
 0x15d   :  { %v3875_v50 = vand.u32 4294901760, %v3147_v48  ;;  %v3876_v14 = vand.u32 4294901760, %v3149_v49  ;;  %v3880_v48 = vand.u32 4294901760, %v3237_v20  ;;  %v3886_v20 = vand.u32 4294901760, %v3257_v30 }
 0x15e   :  { %2709 = vmatpush3.bf16.msra.mxu1 %v2708_v32  ;;  %v1355_v1 = vand.u32 4294901760, %v1354_v56  ;;  %v2825_v57 = vpack.c.bf16 %v1348_v43, %v1341_v60  ;;  %v1368_v54 = vsub.f32 %v3447_v16, %v1367_v44  ;;  %v1376_v60 = vand.u32 4294901760, %v1375_v55 }
 0x15f   :  { %2710 = vmatprep.subr.bf16.mxu1 %v3037_v0  ;;  %v3881_v56 = vand.u32 4294901760, %v3245_v23  ;;  %v3887_v23 = vand.u32 4294901760, %v3262_v35 }
 0x160   :  { %2826 = vmatpush3.bf16.msra.mxu0 %v2825_v57  ;;  %v2828_v33 = vpack.c.bf16 %v1362_v53, %v1355_v1  ;;  %v1369_v62 = vand.u32 4294901760, %v1368_v54  ;;  %v3870_v1 = vpack.c.bf16 %v3267_v38, %v3262_v35  ;;  %v3874_v53 = vand.u32 4294901760, %v3359_v61 }
 0x161   :  { %2827 = vmatprep.subr.bf16.mxu0 %v3037_v0  ;;  %v2753_v57 = vpack.c.bf16 %v3876_v14, %v3875_v50  ;;  %v2762_v11 = vpack.c.bf16 %v3882_v3, %v3881_v56  ;;  %v2771_v54 = vpack.c.bf16 %v3888_v24, %v3887_v23 }
 0x162   :  { %2712 = vmatpush3.bf16.msra.mxu1 %v2711_v40  ;;  %v2831_v32 = vpack.c.bf16 %v1376_v60, %v1369_v62  ;;  %v3871_v40 = vmov 0.0   ;;  %v1221_v62 = vld [vmem:[%s3838_s5 + $0x68] sm:$0xff] }
 0x163   :  { %2713 = vmatprep.subr.bf16.mxu1 %v3037_v0 }
 0x164   :  { %2829 = vmatpush3.bf16.msra.mxu0 %v2828_v33  ;;  %v1220_v33 = vld [vmem:[%s3838_s5 + $0x60] sm:$0xff] }
 0x165   :  { %2830 = vmatprep.subr.bf16.mxu0 %v3037_v0 }
 0x166   :  { %2715 = vmatpush3.bf16.msra.mxu1 %v2714_v41  ;;  %v3872_v41 = vand.u32 4294901760, %v3138_v36  ;;  %v3877_v36 = vand.u32 4294901760, %v3231_v17  ;;  %v3883_v17 = vand.u32 4294901760, %v3249_v25  ;;  %v1218_v25 = vld [vmem:[%s3838_s5 + $0x50] sm:$0xff] }
 0x167   :  { %2716 = vmatprep.subr.bf16.mxu1 %v3037_v0  ;;  %v1262_v30 = vand.u32 4294901760, %v1218_v25 }
 0x168   :  { %2832 = vmatpush3.bf16.msra.mxu0 %v2831_v32 }
 0x169   :  { %2833 = vmatprep.subr.bf16.mxu0 %v3037_v0 }
 0x16a   :  { %2718 = vmatpush3.bf16.msra.mxu1 %v2717_v42  ;;  %v3873_v42 = vand.u32 4294901760, %v3141_v39  ;;  %v3878_v39 = vand.u32 4294901760, %v3233_v18  ;;  %v3884_v18 = vand.u32 4294901760, %v3251_v26  ;;  %v1219_v26 = vld [vmem:[%s3838_s5 + $0x58] sm:$0xff] }
 0x16b   :  { %2719 = vmatprep.subr.bf16.mxu1 %v3037_v0  ;;  %v1265_v35 = vand.u32 4294901760, %v1219_v26 }
 0x16c   :  { %v2756_v46 = vpack.c.bf16 %v3878_v39, %v3877_v36  ;;  %v2765_v31 = vpack.c.bf16 %v3884_v18, %v3883_v17  ;;  %v3890_v36 = vand.u32 4294901760, %v3400_v4 }
 0x16d   :  { %v3625_v55 = vsub.f32 %v1219_v26, %v1265_v35 }
 0x16e   :  { %2721 = vmatpush3.bf16.msra.mxu1 %v2720_v52  ;;  %v2750_v52 = vpack.c.bf16 %v3873_v42, %v3872_v41  ;;  %v1268_v42 = vand.u32 4294901760, %v1220_v33 }
 0x16f   :  { %2722 = vmatprep.subr.bf16.mxu1 %v3037_v0  ;;  %v1402_v41 = vand.u32 4294901760, %v3625_v55 }
 0x171   :  { %v1403_v14 = vsub.f32 %v3625_v55, %v1402_v41 }
 0x172   :  { %2724 = vmatpush3.bf16.msra.mxu1 %v3870_v1 }
 0x173   :  { %2725 = vmatprep.subr.bf16.mxu1 %v3037_v0  ;;  %v1404_v3 = vand.u32 4294901760, %v1403_v14 }
 0x175   :  { %2300 = vmatmul.mubr.f32.vlgmr.msra.gmra.mrb[0].mxu1 %v3359_v61  ;;  %v3879_v61 = vand.u32 4294901760, %v3235_v19  ;;  %v3885_v19 = vand.u32 4294901760, %v3255_v29 }
 0x176   :  { %2727 = vmatpush3.bf16.msra.mxu1 %v3126_v28  ;;  %2334 = vmatprep.mubr.msk.f32.mxu1 %vm3038_vm0, %v3871_v40 }
 0x177   :  { %2728 = vmatprep.subr.bf16.mxu1 %v3037_v0  ;;  %v2759_v49 = vpack.c.bf16 %v3880_v48, %v3879_v61  ;;  %v2768_v43 = vpack.c.bf16 %v3886_v20, %v3885_v19  ;;  %v1222_v48 = vld [vmem:[%s3838_s5 + $0x70] sm:$0xff]  ;;  %v3891_v20 = vand.u32 4294901760, %v3408_v58 }
 0x17a   :  { %2730 = vmatpush3.bf16.msra.mxu1 %v3145_v47 }
 0x17b   :  { %2731 = vmatprep.subr.bf16.mxu1 %v3037_v0 }
 0x17e   :  { %2733 = vmatpush3.bf16.msra.mxu1 %v3191_v59 }
 0x17f   :  { %2734 = vmatprep.subr.bf16.mxu1 %v3037_v0 }
 0x182   :  { %2736 = vmatpush3.bf16.msra.mxu1 %v3201_v2 }
 0x183   :  { %2737 = vmatprep.subr.bf16.mxu1 %v3037_v0 }
 0x186   :  { %2739 = vmatpush3.bf16.msra.mxu1 %v3211_v7 }
 0x187   :  { %2740 = vmatprep.subr.bf16.mxu1 %v3037_v0 }
 0x18a   :  { %2742 = vmatpush3.bf16.msra.mxu1 %v3221_v12 }
 0x18b   :  { %2743 = vmatprep.subr.bf16.mxu1 %v3037_v0 }
 0x18e   :  { %2745 = vmatpush3.bf16.msra.mxu1 %v3253_v27 }
 0x18f   :  { %2746 = vmatprep.subr.bf16.mxu1 %v3037_v0 }
 0x192   :  { %2748 = vmatpush3.bf16.msra.mxu1 %v3265_v37 }
 0x193   :  { %2749 = vmatprep.subr.bf16.mxu1 %v3037_v0 }
 0x195   :  { %2335 = vmatmul.mubr.f32.vlgmr.msra.gmra.mrb[0].mxu1 %v3874_v53 }
 0x196   :  { %2751 = vmatpush3.bf16.msra.mxu1 %v2750_v52  ;;  %2369 = vmatprep.mubr.msk.f32.mxu1 %vm3038_vm0, %v3871_v40  ;;  %v1271_v52 = vand.u32 4294901760, %v1221_v62 }
 0x197   :  { %2752 = vmatprep.subr.bf16.mxu1 %v3037_v0 }
 0x198   :  { %v3649_v61 = vsub.f32 %v1221_v62, %v1271_v52 }
 0x19a   :  { %2754 = vmatpush3.bf16.msra.mxu1 %v2753_v57  ;;  %v3889_v57 = vand.u32 4294901760, %v3395_v51  ;;  %v1274_v51 = vand.u32 4294901760, %v1222_v48  ;;  %v1416_v17 = vand.u32 4294901760, %v3649_v61 }
 0x19b   :  { %2755 = vmatprep.subr.bf16.mxu1 %v3037_v0 }
 0x19c   :  { %v3645_v39 = vpack.c.bf16 %v3890_v36, %v3889_v57 }
 0x19e   :  { %2757 = vmatpush3.bf16.msra.mxu1 %v2756_v46  ;;  %v3647_v46 = vsub.f32 %v1220_v33, %v1268_v42 }
 0x19f   :  { %2758 = vmatprep.subr.bf16.mxu1 %v3037_v0 }
 0x1a0   :  { %v1409_v4 = vand.u32 4294901760, %v3647_v46 }
 0x1a2   :  { %2760 = vmatpush3.bf16.msra.mxu1 %v2759_v49  ;;  %v1223_v49 = vld [vmem:[%s3838_s5 + $0x78] sm:$0xff]  ;;  %v1410_v24 = vsub.f32 %v3647_v46, %v1409_v4 }
 0x1a3   :  { %2761 = vmatprep.subr.bf16.mxu1 %v3037_v0 }
 0x1a4   :  { %v1411_v58 = vand.u32 4294901760, %v1410_v24  ;;  %v3893_v24 = vand.u32 4294901760, %v3415_v6 }
 0x1a6   :  { %2763 = vmatpush3.bf16.msra.mxu1 %v2762_v11  ;;  %v1277_v11 = vand.u32 4294901760, %v1223_v49 }
 0x1a7   :  { %2764 = vmatprep.subr.bf16.mxu1 %v3037_v0 }
 0x1a8   :  { %v3664_v19 = vsub.f32 %v1223_v49, %v1277_v11 }
 0x1aa   :  { %2766 = vmatpush3.bf16.msra.mxu1 %v2765_v31  ;;  %v3662_v31 = vsub.f32 %v1222_v48, %v1274_v51  ;;  %v2846_v48 = vpack.c.bf16 %v3417_v8, %v3415_v6  ;;  %v3897_v6 = vand.u32 4294901760, %v3428_v9 }
 0x1ab   :  { %2767 = vmatprep.subr.bf16.mxu1 %v3037_v0 }
 0x1ae   :  { %2769 = vmatpush3.bf16.msra.mxu1 %v2768_v43  ;;  %v3892_v43 = vand.u32 4294901760, %v3413_v5 }
 0x1af   :  { %2770 = vmatprep.subr.bf16.mxu1 %v3037_v0 }
 0x1b0   :  { %v3670_v23 = vpack.c.bf16 %v3892_v43, %v3891_v20  ;;  %v2855_v43 = vpack.c.bf16 %v3461_v45, %v3447_v16 }
 0x1b2   :  { %2772 = vmatpush3.bf16.msra.mxu1 %v2771_v54  ;;  %v1417_v54 = vsub.f32 %v3649_v61, %v1416_v17 }
 0x1b3   :  { %2773 = vmatprep.subr.bf16.mxu1 %v3037_v0 }
 0x1b4   :  { %v1418_v5 = vand.u32 4294901760, %v1417_v54  ;;  %v3894_v54 = vand.u32 4294901760, %v3417_v8  ;;  %v3898_v8 = vand.u32 4294901760, %v3433_v63 }
 0x1b5   :  { %2370 = vmatmul.mubr.f32.vlgmr.msra.gmra.mrb[0].mxu1 %v3356_v13 }
 0x1b6   :  { %2775 = vmatpush3.bf16.msra.mxu1 %v3126_v28  ;;  %2404 = vmatprep.mubr.msk.f32.mxu1 %vm3038_vm0, %v3871_v40  ;;  %v1216_v28 = vld [vmem:[%s3838_s5 + $0x40] sm:$0xff] }
 0x1b7   :  { %2776 = vmatprep.subr.bf16.mxu1 %v3037_v0 }
 0x1ba   :  { %2778 = vmatpush3.bf16.msra.mxu1 %v3145_v47  ;;  %v1217_v47 = vld [vmem:[%s3838_s5 + $0x48] sm:$0xff] }
 0x1bb   :  { %2779 = vmatprep.subr.bf16.mxu1 %v3037_v0 }
 0x1be   :  { %2781 = vmatpush3.bf16.msra.mxu1 %v3191_v59  ;;  %v1256_v59 = vand.u32 4294901760, %v1216_v28 }
 0x1bf   :  { %2782 = vmatprep.subr.bf16.mxu1 %v3037_v0 }
 0x1c2   :  { %2784 = vmatpush3.bf16.msra.mxu1 %v3201_v2  ;;  %v1259_v2 = vand.u32 4294901760, %v1217_v47 }
 0x1c3   :  { %2785 = vmatprep.subr.bf16.mxu1 %v3037_v0 }
 0x1c6   :  { %2787 = vmatpush3.bf16.msra.mxu1 %v3211_v7  ;;  %v3605_v7 = vsub.f32 %v1216_v28, %v1256_v59  ;;  %v1423_v28 = vand.u32 4294901760, %v3662_v31 }
 0x1c7   :  { %2788 = vmatprep.subr.bf16.mxu1 %v3037_v0 }
 0x1c8   :  { %v1424_v26 = vsub.f32 %v3662_v31, %v1423_v28 }
 0x1ca   :  { %2790 = vmatpush3.bf16.msra.mxu1 %v3221_v12  ;;  %v3607_v12 = vsub.f32 %v1217_v47, %v1259_v2  ;;  %v1430_v47 = vand.u32 4294901760, %v3664_v19  ;;  %v1425_v33 = vand.u32 4294901760, %v1424_v26  ;;  %v3896_v26 = vand.u32 4294901760, %v3423_v10 }
 0x1cb   :  { %2791 = vmatprep.subr.bf16.mxu1 %v3037_v0 }
 0x1cc   :  { %v1388_v29 = vand.u32 4294901760, %v3607_v12 }
 0x1ce   :  { %2793 = vmatpush3.bf16.msra.mxu1 %v3253_v27  ;;  %v1381_v27 = vand.u32 4294901760, %v3605_v7  ;;  %v1389_v38 = vsub.f32 %v3607_v12, %v1388_v29 }
 0x1cf   :  { %2794 = vmatprep.subr.bf16.mxu1 %v3037_v0 }
 0x1d0   :  { %v1390_v32 = vand.u32 4294901760, %v1389_v38  ;;  %v2840_v38 = vpack.c.bf16 %v1418_v5, %v1411_v58  ;;  %v2894_v58 = vpack.c.bf16 %v3894_v54, %v3893_v24  ;;  %v3895_v5 = vand.u32 4294901760, %v3419_v22 }
 0x1d2   :  { %2796 = vmatpush3.bf16.msra.mxu1 %v3265_v37  ;;  %v1382_v37 = vsub.f32 %v3605_v7, %v1381_v27 }
 0x1d3   :  { %2797 = vmatprep.subr.bf16.mxu1 %v3037_v0 }
 0x1d4   :  { %v1383_v60 = vand.u32 4294901760, %v1382_v37  ;;  %v1431_v37 = vsub.f32 %v3664_v19, %v1430_v47 }
 0x1d5   :  { %2405 = vmatmul.mubr.f32.vlgmr.msra.gmra.mrb[0].mxu1 %v3356_v13  ;;  %v3623_v13 = vsub.f32 %v1218_v25, %v1262_v30  ;;  %v3682_v25 = vpack.c.bf16 %v1259_v2, %v1256_v59  ;;  %v3699_v2 = vpack.c.bf16 %v1271_v52, %v1268_v42  ;;  %v2867_v42 = vpack.c.bf16 %v3664_v19, %v3662_v31  ;;  %v1895_v52 = vld [vmem:[%s3837_s4] ss:$0 sm:$0xff] }
 0x1d6   :  { %2799 = vmatpush3.bf16.msra.mxu1 %v3421_v21  ;;  %2439 = vmatprep.mubr.msk.f32.mxu1 %vm3038_vm0, %v3871_v40  ;;  %v2834_v53 = vpack.c.bf16 %v1390_v32, %v1383_v60  ;;  %v1432_v62 = vand.u32 4294901760, %v1431_v37  ;;  %v3692_v60 = vpack.c.bf16 %v1265_v35, %v1262_v30  ;;  %v3703_v30 = vpack.c.bf16 %v1277_v11, %v1274_v51 }
 0x1d7   :  { %2800 = vmatprep.subr.bf16.mxu1 %v3037_v0  ;;  %v1395_v1 = vand.u32 4294901760, %v3623_v13  ;;  %v2858_v35 = vpack.c.bf16 %v3607_v12, %v3605_v7  ;;  %v2861_v32 = vpack.c.bf16 %v3625_v55, %v3623_v13  ;;  %v2897_v37 = vpack.c.bf16 %v3896_v26, %v3895_v5 }
 0x1d8   :  { %2835 = vmatpush3.bf16.msra.mxu0 %v2834_v53  ;;  %v2843_v59 = vpack.c.bf16 %v1432_v62, %v1425_v33  ;;  %v2864_v53 = vpack.c.bf16 %v3649_v61, %v3647_v46  ;;  %v1872_v12 = vlaneseq }
 0x1d9   :  { %v1396_v50 = vsub.f32 %v3623_v13, %v1395_v1  ;;  %2836 = vmatprep.subr.bf16.mxu0 %v3037_v0 }
 0x1da   :  { %2802 = vmatpush3.bf16.msra.mxu1 %v3478_v15 }
 0x1db   :  { %2803 = vmatprep.subr.bf16.mxu1 %v3037_v0  ;;  %v1397_v56 = vand.u32 4294901760, %v1396_v50 }
 0x1dd   :  { %v2837_v18 = vpack.c.bf16 %v1404_v3, %v1397_v56  ;;  %v2849_v3 = vpack.c.bf16 %v3423_v10, %v3419_v22  ;;  %v2903_v10 = vpack.c.bf16 %v1374_v34, %v1367_v44  ;;  %v2906_v22 = vpack.c.bf16 %v1388_v29, %v1381_v27 }
 0x1de   :  { %2805 = vmatpush3.bf16.msra.mxu1 %v3645_v39  ;;  %v2912_v34 = vpack.c.bf16 %v1416_v17, %v1409_v4  ;;  %v2915_v44 = vpack.c.bf16 %v1430_v47, %v1423_v28  ;;  %v1873_v27 = vand.u32 127, %v1872_v12 }
 0x1df   :  { %2806 = vmatprep.subr.bf16.mxu1 %v3037_v0  ;;  %2838 = vmatpush3.bf16.msra.mxu0 %v2837_v18  ;;  %v2852_v18 = vpack.c.bf16 %v3433_v63, %v3428_v9  ;;  %v2909_v63 = vpack.c.bf16 %v1402_v41, %v1395_v1 }
 0x1e0   :  { %2839 = vmatprep.subr.bf16.mxu0 %v3037_v0  ;;  %vm1874_vm2 = vcmp.lt.s32.totalorder %v1873_v27, 4 }
 0x1e2   :  { %2808 = vmatpush3.bf16.msra.mxu1 %v3670_v23 }
 0x1e3   :  { %2809 = vmatprep.subr.bf16.mxu1 %v3037_v0  ;;  %2841 = vmatpush3.bf16.msra.mxu0 %v2840_v38  ;;  %v2900_v38 = vpack.c.bf16 %v3898_v8, %v3897_v6 }
 0x1e4   :  { %2842 = vmatprep.subr.bf16.mxu0 %v3037_v0 }
 0x1e6   :  { %2811 = vmatpush3.bf16.msra.mxu1 %v3682_v25 }
 0x1e7   :  { %2812 = vmatprep.subr.bf16.mxu1 %v3037_v0  ;;  %2844 = vmatpush3.bf16.msra.mxu0 %v2843_v59 }
 0x1e8   :  { %2845 = vmatprep.subr.bf16.mxu0 %v3037_v0 }
 0x1ea   :  { %2814 = vmatpush3.bf16.msra.mxu1 %v3692_v60 }
 0x1eb   :  { %2815 = vmatprep.subr.bf16.mxu1 %v3037_v0 }
 0x1ee   :  { %2817 = vmatpush3.bf16.msra.mxu1 %v3699_v2 }
 0x1ef   :  { %2818 = vmatprep.subr.bf16.mxu1 %v3037_v0 }
 0x1f2   :  { %2820 = vmatpush3.bf16.msra.mxu1 %v3703_v30 }
 0x2a8   :  { %v1203_v50 = vpop.f32.mrb[0].mxu1 }
 0x2a9   :  { %v2942_v14 = vadd.f32 %v1895_v52, %v1203_v50  ;;  %v2406_v57 = vpop.f32.mrb[1].mxu1 }
 0x2ab   :  { %2982 = vtanh.f32 %v2942_v14 }
 0x2b5   :  { %v2983_v36 = vpop.eup %2982 }
 0x2b6   :  { %v3719_v49 = vand.u32 4294901760, %v2983_v36 }
 0x2b8   :  { %2475 = vmatmul.mubr.f32.vlgmr.msra.gmra.mrb[2].mxu0 %v3719_v49  ;;  %v1313_v56 = vsub.f32 %v2983_v36, %v3719_v49 }
 0x2b9   :  { %2847 = vmatpush3.bf16.msra.mxu0 %v2846_v48  ;;  %2509 = vmatprep.mubr.msk.f32.mxu0 %vm3038_vm0, %v3871_v40 }
 0x2ba   :  { %2848 = vmatprep.subr.bf16.mxu0 %v3037_v0  ;;  %v1314_v51 = vand.u32 4294901760, %v1313_v56 }
 0x2bc   :  { %v1315_v11 = vsub.f32 %v1313_v56, %v1314_v51 }
 0x2bd   :  { %2850 = vmatpush3.bf16.msra.mxu0 %v2849_v3 }
 0x2be   :  { %2851 = vmatprep.subr.bf16.mxu0 %v3037_v0  ;;  %v1316_v20 = vand.u32 4294901760, %v1315_v11 }
 0x2c0   :  { %2440 = vmatmul.mubr.f32.vlgmr.msra.gmra.mrb[2].mxu1 %v1316_v20 }
 0x2c1   :  { %2853 = vmatpush3.bf16.msra.mxu0 %v2852_v18 }
 0x2c2   :  { %2854 = vmatprep.subr.bf16.mxu0 %v3037_v0 }
 0x2c5   :  { %2856 = vmatpush3.bf16.msra.mxu0 %v2855_v43 }
 0x2c6   :  { %2857 = vmatprep.subr.bf16.mxu0 %v3037_v0 }
 0x2c9   :  { %2859 = vmatpush3.bf16.msra.mxu0 %v2858_v35 }
 0x2ca   :  { %2860 = vmatprep.subr.bf16.mxu0 %v3037_v0 }
 0x2cd   :  { %2862 = vmatpush3.bf16.msra.mxu0 %v2861_v32 }
 0x2ce   :  { %2863 = vmatprep.subr.bf16.mxu0 %v3037_v0 }
 0x2d1   :  { %2865 = vmatpush3.bf16.msra.mxu0 %v2864_v53 }
 0x2d2   :  { %2866 = vmatprep.subr.bf16.mxu0 %v3037_v0 }
 0x2d5   :  { %2868 = vmatpush3.bf16.msra.mxu0 %v2867_v42 }
 0x2d6   :  { %2869 = vmatprep.subr.bf16.mxu0 %v3037_v0 }
 0x2d8   :  { %2510 = vmatmul.mubr.f32.vlgmr.msra.gmra.mrb[2].mxu0 %v1313_v56 }
 0x2d9   :  { %2871 = vmatpush3.bf16.msra.mxu0 %v3421_v21  ;;  %2544 = vmatprep.mubr.msk.f32.mxu0 %vm3038_vm0, %v3871_v40 }
 0x2da   :  { %2872 = vmatprep.subr.bf16.mxu0 %v3037_v0 }
 0x2dd   :  { %2874 = vmatpush3.bf16.msra.mxu0 %v3478_v15 }
 0x2de   :  { %2875 = vmatprep.subr.bf16.mxu0 %v3037_v0 }
 0x2e1   :  { %2877 = vmatpush3.bf16.msra.mxu0 %v3645_v39 }
 0x2e2   :  { %2878 = vmatprep.subr.bf16.mxu0 %v3037_v0 }
 0x2e5   :  { %2880 = vmatpush3.bf16.msra.mxu0 %v3670_v23 }
 0x2e6   :  { %2881 = vmatprep.subr.bf16.mxu0 %v3037_v0 }
 0x2e9   :  { %2883 = vmatpush3.bf16.msra.mxu0 %v3682_v25 }
 0x2ea   :  { %2884 = vmatprep.subr.bf16.mxu0 %v3037_v0 }
 0x2ed   :  { %2886 = vmatpush3.bf16.msra.mxu0 %v3692_v60 }
 0x2ee   :  { %2887 = vmatprep.subr.bf16.mxu0 %v3037_v0 }
 0x2f1   :  { %2889 = vmatpush3.bf16.msra.mxu0 %v3699_v2 }
 0x2f2   :  { %2890 = vmatprep.subr.bf16.mxu0 %v3037_v0 }
 0x2f5   :  { %2892 = vmatpush3.bf16.msra.mxu0 %v3703_v30 }
 0x2f6   :  { %2893 = vmatprep.subr.bf16.mxu0 %v3037_v0 }
 0x2f8   :  { %2545 = vmatmul.mubr.f32.vlgmr.msra.gmra.mrb[2].mxu0 %v1314_v51 }
 0x2f9   :  { %2895 = vmatpush3.bf16.msra.mxu0 %v2894_v58  ;;  %2579 = vmatprep.mubr.msk.f32.mxu0 %vm3038_vm0, %v3871_v40 }
 0x2fa   :  { %2896 = vmatprep.subr.bf16.mxu0 %v3037_v0 }
 0x2fd   :  { %2898 = vmatpush3.bf16.msra.mxu0 %v2897_v37 }
 0x2fe   :  { %2899 = vmatprep.subr.bf16.mxu0 %v3037_v0 }
 0x301   :  { %2901 = vmatpush3.bf16.msra.mxu0 %v2900_v38 }
 0x302   :  { %2902 = vmatprep.subr.bf16.mxu0 %v3037_v0 }
 0x305   :  { %2904 = vmatpush3.bf16.msra.mxu0 %v2903_v10 }
 0x306   :  { %2905 = vmatprep.subr.bf16.mxu0 %v3037_v0 }
 0x309   :  { %2907 = vmatpush3.bf16.msra.mxu0 %v2906_v22 }
 0x30a   :  { %2908 = vmatprep.subr.bf16.mxu0 %v3037_v0 }
 0x30d   :  { %2910 = vmatpush3.bf16.msra.mxu0 %v2909_v63 }
 0x30e   :  { %2911 = vmatprep.subr.bf16.mxu0 %v3037_v0 }
 0x311   :  { %2913 = vmatpush3.bf16.msra.mxu0 %v2912_v34 }
 0x312   :  { %2914 = vmatprep.subr.bf16.mxu0 %v3037_v0 }
 0x315   :  { %2916 = vmatpush3.bf16.msra.mxu0 %v2915_v44 }
 0x316   :  { %2917 = vmatprep.subr.bf16.mxu0 %v3037_v0 }
 0x318   :  { %2580 = vmatmul.mubr.f32.vlgmr.msra.gmra.mrb[2].mxu0 %v3719_v49 }
 0x319   :  { %2919 = vmatpush3.bf16.msra.mxu0 %v3421_v21  ;;  %2614 = vmatprep.mubr.msk.f32.mxu0 %vm3038_vm0, %v3871_v40  ;;  %v1896_v21 = vld [vmem:[%s3839_s6] ss:$0 sm:$0xff] }
 0x31a   :  { %2920 = vmatprep.subr.bf16.mxu0 %v3037_v0 }
 0x31d   :  { %2922 = vmatpush3.bf16.msra.mxu0 %v3478_v15 }
 0x31e   :  { %2923 = vmatprep.subr.bf16.mxu0 %v3037_v0 }
 0x321   :  { %2925 = vmatpush3.bf16.msra.mxu0 %v3645_v39 }
 0x322   :  { %2926 = vmatprep.subr.bf16.mxu0 %v3037_v0 }
 0x325   :  { %2928 = vmatpush3.bf16.msra.mxu0 %v3670_v23 }
 0x326   :  { %2929 = vmatprep.subr.bf16.mxu0 %v3037_v0 }
 0x329   :  { %2931 = vmatpush3.bf16.msra.mxu0 %v3682_v25 }
 0x32a   :  { %2932 = vmatprep.subr.bf16.mxu0 %v3037_v0 }
 0x32d   :  { %2934 = vmatpush3.bf16.msra.mxu0 %v3692_v60 }
 0x32e   :  { %2935 = vmatprep.subr.bf16.mxu0 %v3037_v0 }
 0x331   :  { %2937 = vmatpush3.bf16.msra.mxu0 %v3699_v2 }
 0x332   :  { %2938 = vmatprep.subr.bf16.mxu0 %v3037_v0 }
 0x335   :  { %2940 = vmatpush3.bf16.msra.mxu0 %v3703_v30 }
 0x338   :  { %2615 = vmatmul.mubr.f32.vlgmr.msra.gmra.mrb[2].mxu0 %v3719_v49 }
 0x393   :  { %v1318_v45 = vpop.f32.mrb[2].mxu1 }
 0x394   :  { %v2441_v9 = vpop.f32.mrb[3].mxu1  ;;  %v1319_v15 = vadd.f32 %v1896_v21, %v1318_v45 }
 0x40b   :  { %v1868_v16 = vpop.f32.mrb[2].mxu0 }
 0x40c   :  { %v2944_v40 = vadd.f32 %v1868_v16, %v1319_v15  ;;  %v2616_v7 = vpop.f32.mrb[3].mxu0 }
 0x40e   :  { %2984 = vtanh.f32 %v2944_v40 }
 0x418   :  { %v2985_v0 = vpop.eup %2984 }
 0x419   :  { %v1876_v29 = vsel %vm1874_vm2, %v2985_v0, %v2944_v40 }
 0x41a   :  { %1878 = vst.msk [vmem:[#allocation5] sm:$0xff] %vm1877_vm3, %v1876_v29 }
 0x41b   :  { %3019 = shalt.err (!%p3016_p12)
}
 0x41c   :  { %s3020_s10 = scalar_lea.hbm %s3840_s7, 128 }
 0x41d   :  { %p3021_p13 = scmp.ne.s32.totalorder %s3840_s7, %s3020_s10  ;;  %p3024_p0 = scmp.lt.u32.totalorder %s3020_s10, %s3840_s7 }
 0x41f   :  { %p3026_p1 = pnand %p3024_p0, %p3021_p13 }
 0x421   :  { %3029 = shalt.err (!%p3026_p1)
}
 0x422   :  { %1888 = dma.vmem_to_hbm [thread:$0]  %s1886_s30, 128, %s3840_s7, [#allocation4]  }
 0x423   :  { %3032 = dma.done.wait [#allocation4], 128  }
 0x424   :  { %3033 = vsyncadd [#allocation4], 4294967168 }
 0x425   :  { %1892 = vsyncpa [#allocation3], 1 }
 0x426   :  { %1893 = vsyncpa [#allocation4], 1 }

</bundles_post_ra>
